<compile_context>
chip_gen: v5e
topology: v5e:2x2
jax: 0.10.0
libtpu: 0.0.40
codegen_flags: <defaults>
</compile_context>

<pallas_src>
import jax
import jax.numpy as jnp
import numpy as np
from jax import lax
from jax.experimental import pallas as pl
from jax.experimental.pallas import tpu as pltpu

# ---------------- problem sizes (small, consistent with the module) ----------
B = 2          # batch
S = 16         # sequence length
D = 32         # hidden size (config.input_dim)
N_SENT = 4     # number of supporting-fact sentences
N_TYPES = 4    # config.label_type_num
VOCAB = 64
NEG = 1e30

LANES = 128
_OFF_START = 0
_OFF_END = S
_OFF_TYPE = 2 * S
_OFF_SP = 2 * S + N_TYPES
_SLAB_USED = 2 * S + N_TYPES + N_SENT


def _argmax_last(a):
    """First index of the max along the last axis (matches torch tie-breaking)."""
    m = jnp.max(a, axis=-1, keepdims=True)
    idx = lax.broadcasted_iota(jnp.int32, a.shape, a.ndim - 1)
    big = jnp.iinfo(jnp.int32).max
    return jnp.min(jnp.where(a == m, idx, big), axis=-1)


# ---------------- fused encoder-stand-in + SimplePredictionLayer kernel ------
def _fused_kernel(emb_ref, wenc_ref, whead_ref, wtype_ref, bias_ref,
                  masks_ref, amap_ref, band_ref, out_ref, pos_ref):
    # --- encoder stand-in: dense (+bias via ones column) + tanh, on the MXU --
    # TODO(synk): the injected pretrained BERT/Electra encoder has no Pallas
    # equivalent; this deterministic dense+tanh projection stands in for it.
    hidden2d = jnp.tanh(
        jnp.dot(emb_ref[...], wenc_ref[...],
                preferred_element_type=jnp.float32))            # (B*S, D)
    x = hidden2d.reshape(B, S, D)                               # (B, S, D)

    cmask = masks_ref[0]                                        # (B, S)
    qmap = masks_ref[1]                                         # (B, S)
    amap = amap_ref[...]                                        # (B, S, N)

    # --- pooled states (sp pooling vectorized over sentences) ----------------
    sp_state = jnp.max(amap[:, :, :, None] * x[:, :, None, :], axis=1)  # (B,N,D)
    type_state = jnp.max(x, axis=1)                                     # (B, D)

    # --- start / end / sp heads: batched MXU matmuls (no XLU sum reductions) -
    w_heads = jnp.broadcast_to(whead_ref[...][None], (B, 8, D))   # hoisted once
    tok_head = jnp.einsum('bod,bsd->bos', w_heads, x,
                          preferred_element_type=jnp.float32)     # (B, 8, S)
    sp_head = jnp.einsum('bod,bnd->bon', w_heads, sp_state,
                         preferred_element_type=jnp.float32)      # (B, 8, N)

    cmask_bias = NEG * (1.0 - cmask)
    start_logits = (tok_head[:, 0, :] + bias_ref[0]) - cmask_bias   # (B, S)
    end_logits = (tok_head[:, 1, :] + bias_ref[1]) - cmask_bias     # (B, S)
    sp_logits = sp_head[:, 2, :] + bias_ref[2]                      # (B, N)

    # --- type head: bias folded via ones column ------------------------------
    type_aug = jnp.concatenate(
        [type_state, jnp.ones((B, 1), jnp.float32)], axis=1)        # (B, D+1)
    type_logits = jnp.dot(type_aug, wtype_ref[...],
                          preferred_element_type=jnp.float32)       # (B, T)

    # --- span scores: qmap folded into start, precomputed band bias ----------
    outer = ((start_logits - NEG * qmap)[:, :, None]
             + end_logits[:, None, :]
             + band_ref[...][None, :, :])                           # (B, S, S)
    spos = _argmax_last(jnp.max(outer, axis=2))                     # (B,) int32
    epos = _argmax_last(jnp.max(outer, axis=1))                     # (B,) int32

    # --- lane-dense packed outputs: one f32 slab + one small int32 vector ----
    pad = jnp.zeros((B, LANES - _SLAB_USED), jnp.float32)
    out_ref[...] = jnp.concatenate(
        [start_logits, end_logits, type_logits, sp_logits, pad], axis=-1)
    pos_ref[...] = jnp.concatenate(
        [spos[:, None], epos[:, None], jnp.zeros((B, 6), jnp.int32)], axis=-1)


def _full(shape):
    return pl.BlockSpec(shape, lambda i: (0,) * len(shape))


# ---------------- BertSupportNet forward (wrapper glue) ----------------------
def bert_support_net_forward(batch, params):
    ids = batch['context_idxs']                      # (B, S) int32
    segs = batch['segment_idxs']                     # (B, S) int32
    cmask = batch['context_mask'].astype(jnp.float32)
    qmap = batch['query_mapping'].astype(jnp.float32)
    amap = batch['all_mapping'].astype(jnp.float32)

    # embeddings (plain JAX gather) + ones column so the encoder bias rides
    # inside the in-kernel matmul.
    emb = (params['tok_emb'][ids] + params['seg_emb'][segs]
           + params['pos_emb'][None, :S, :]).astype(jnp.float32)     # (B, S, D)
    emb_aug = jnp.concatenate(
        [emb.reshape(B * S, D), jnp.ones((B * S, 1), jnp.float32)], axis=1)

    # consolidated parameters: 10 tiny tensors -> 4 kernel inputs.
    w_enc_aug = jnp.concatenate([params['w_enc'], params['b_enc']], axis=0)   # (D+1, D)
    w_heads = jnp.concatenate(
        [params['w_start'], params['w_end'], params['w_sp'],
         jnp.zeros((5, D), jnp.float32)], axis=0)                             # (8, D)
    w_type_aug = jnp.concatenate([params['w_type'], params['b_type']], axis=0)  # (D+1, T)
    bias_vec = jnp.concatenate(
        [params['b_start'][0], params['b_end'][0], params['b_sp'][0],
         jnp.zeros((1,), jnp.float32)], axis=0)                               # (4,) -> SMEM

    masks = jnp.stack([cmask, qmap], axis=0)                                  # (2, B, S)

    # static banded span mask tril(triu(ones,0),15) as an additive bias.
    ii = jnp.arange(S)[:, None]
    jj = jnp.arange(S)[None, :]
    band = ((jj >= ii) & (jj <= ii + 15)).astype(jnp.float32)
    band_bias = -NEG * (1.0 - band)                                           # (S, S)

    slab, pos = pl.pallas_call(
        _fused_kernel,
        out_shape=(jax.ShapeDtypeStruct((B, LANES), jnp.float32),
                   jax.ShapeDtypeStruct((B, 8), jnp.int32)),
        grid=(1,),
        in_specs=[
            _full((B * S, D + 1)),                                  # emb_aug
            _full((D + 1, D)),                                      # w_enc_aug
            _full((8, D)),                                          # w_heads
            _full((D + 1, N_TYPES)),                                # w_type_aug
            pl.BlockSpec(memory_space=pltpu.MemorySpace.SMEM),      # biases
            _full((2, B, S)),                                       # masks
            _full((B, S, N_SENT)),                                  # all_mapping
            _full((S, S)),                                          # band bias
        ],
        out_specs=(_full((B, LANES)), _full((B, 8))),
        compiler_params=pltpu.CompilerParams(
            dimension_semantics=("arbitrary",)),
    )(emb_aug, w_enc_aug, w_heads, w_type_aug, bias_vec, masks, amap, band_bias)

    start_logits = slab[:, _OFF_START:_OFF_START + S]
    end_logits = slab[:, _OFF_END:_OFF_END + S]
    type_logits = slab[:, _OFF_TYPE:_OFF_TYPE + N_TYPES]
    sp_logits = slab[:, _OFF_SP:_OFF_SP + N_SENT]
    return (start_logits, end_logits, type_logits, sp_logits, pos[:, 0], pos[:, 1])


# ---------------- pure-JAX reference (mirrors the torch module) --------------
def _reference_forward(batch, params):
    ids = batch['context_idxs']
    segs = batch['segment_idxs']
    cmask = batch['context_mask']
    qmap = batch['query_mapping']
    amap = batch['all_mapping']
    emb = (params['tok_emb'][ids] + params['seg_emb'][segs]
           + params['pos_emb'][None, :S, :]).astype(jnp.float32)
    x = jnp.tanh(emb.reshape(B * S, D) @ params['w_enc']
                 + params['b_enc']).reshape(B, S, D)
    start = jnp.einsum('bsd,d->bs', x, params['w_start'][0]) + params['b_start'][0, 0]
    end = jnp.einsum('bsd,d->bs', x, params['w_end'][0]) + params['b_end'][0, 0]
    start_logits = start - NEG * (1.0 - cmask)
    end_logits = end - NEG * (1.0 - cmask)
    sp_state = jnp.max(amap[:, :, :, None] * x[:, :, None, :], axis=1)
    sp_logits = jnp.einsum('bnd,d->bn', sp_state, params['w_sp'][0]) + params['b_sp'][0, 0]
    type_state = jnp.max(x, axis=1)
    type_logits = type_state @ params['w_type'] + params['b_type'][0]
    ii = jnp.arange(S)[:, None]
    jj = jnp.arange(S)[None, :]
    band = ((jj >= ii) & (jj <= ii + 15)).astype(jnp.float32)
    outer = start_logits[:, :, None] + end_logits[:, None, :]
    outer = outer - NEG * (1.0 - band)[None]
    outer = outer - NEG * qmap[:, :, None]
    spos = jnp.argmax(jnp.max(outer, axis=2), axis=1).astype(jnp.int32)
    epos = jnp.argmax(jnp.max(outer, axis=1), axis=1).astype(jnp.int32)
    return start_logits, end_logits, type_logits, sp_logits, spos, epos


# ---------------- deterministic parameter init -------------------------------
def init_params(key):
    ks = jax.random.split(key, 12)
    f = lambda k, shape: (0.02 * jax.random.normal(k, shape)).astype(jnp.float32)
    return {
        'tok_emb': f(ks[0], (VOCAB, D)),
        'seg_emb': f(ks[1], (2, D)),
        'pos_emb': f(ks[2], (S, D)),
        'w_enc':   f(ks[3], (D, D)),
        'b_enc':   f(ks[4], (1, D)),
        'w_start': f(ks[5], (1, D)),
        'b_start': f(ks[6], (1, 1)),
        'w_end':   f(ks[7], (1, D)),
        'b_end':   f(ks[8], (1, 1)),
        'w_sp':    f(ks[9], (1, D)),
        'b_sp':    f(ks[10], (1, 1)),
        'w_type':  f(ks[11], (D, N_TYPES)),
        'b_type':  jnp.zeros((1, N_TYPES), jnp.float32),
    }


if __name__ == "__main__":
    key = jax.random.PRNGKey(0)
    kp, k1, k2 = jax.random.split(key, 3)
    params = init_params(kp)

    ids = jax.random.randint(k1, (B, S), 0, VOCAB, dtype=jnp.int32)
    segs = jnp.concatenate([jnp.zeros((B, S // 2), jnp.int32),
                            jnp.ones((B, S // 2), jnp.int32)], axis=1)
    context_mask = jnp.ones((B, S), jnp.float32).at[:, S - 2:].set(0.0)
    query_mapping = jnp.zeros((B, S), jnp.float32).at[:, :3].set(1.0)
    all_mapping = (jax.random.uniform(k2, (B, S, N_SENT)) > 0.5).astype(jnp.float32)

    batch = {
        'context_idxs': ids,
        'context_mask': context_mask,
        'segment_idxs': segs,
        'query_mapping': query_mapping,
        'all_mapping': all_mapping,
    }

    outs = bert_support_net_forward(batch, params)
    outs = jax.block_until_ready(outs)
    start_logits, end_logits, type_logits, sp_logits, spos, epos = outs

    assert start_logits.shape == (B, S)
    assert end_logits.shape == (B, S)
    assert type_logits.shape == (B, N_TYPES)
    assert sp_logits.shape == (B, N_SENT)
    assert spos.shape == (B,) and epos.shape == (B,)

    # correctness vs. pure-JAX reference of the torch module
    r_start, r_end, r_type, r_sp, r_spos, r_epos = _reference_forward(batch, params)
    np.testing.assert_allclose(np.asarray(start_logits), np.asarray(r_start),
                               rtol=2e-3, atol=2e-3)
    np.testing.assert_allclose(np.asarray(end_logits), np.asarray(r_end),
                               rtol=2e-3, atol=2e-3)
    np.testing.assert_allclose(np.asarray(type_logits), np.asarray(r_type),
                               rtol=2e-3, atol=2e-3)
    np.testing.assert_allclose(np.asarray(sp_logits), np.asarray(r_sp),
                               rtol=2e-3, atol=2e-3)
    np.testing.assert_array_equal(np.asarray(spos, dtype=np.int32),
                                  np.asarray(r_spos, dtype=np.int32))
    np.testing.assert_array_equal(np.asarray(epos, dtype=np.int32),
                                  np.asarray(r_epos, dtype=np.int32))

    print("KERNEL_OK")
</pallas_src>

<mosaic_0001>
module attributes {stable_mosaic.version = 11 : i64} {
  func.func @_fused_kernel(%arg0: i32, %arg1: memref<32x33xf32, #tpu.memory_space<vmem>>, %arg2: memref<33x32xf32, #tpu.memory_space<vmem>>, %arg3: memref<8x32xf32, #tpu.memory_space<vmem>>, %arg4: memref<33x4xf32, #tpu.memory_space<vmem>>, %arg5: memref<4xf32, #tpu.memory_space<smem>>, %arg6: memref<2x2x16xf32, #tpu.memory_space<vmem>>, %arg7: memref<2x16x4xf32, #tpu.memory_space<vmem>>, %arg8: memref<16x16xf32, #tpu.memory_space<vmem>>, %arg9: memref<2x128xf32, #tpu.memory_space<vmem>>, %arg10: memref<2x8xi32, #tpu.memory_space<vmem>>) attributes {dimension_semantics = [#tpu.dimension_semantics<arbitrary>], iteration_bounds = array<i64: 1>, scalar_prefetch = 0 : i64, scratch_operands = 0 : i64, tpu.core_type = #tpu.core_type<tc>, window_params = [{pipeline_mode = #tpu.pipeline_mode<synchronous>, transform_indices = @transform_0, window_bounds = array<i64: 32, 33>}, {pipeline_mode = #tpu.pipeline_mode<synchronous>, transform_indices = @transform_1, window_bounds = array<i64: 33, 32>}, {pipeline_mode = #tpu.pipeline_mode<synchronous>, transform_indices = @transform_2, window_bounds = array<i64: 8, 32>}, {pipeline_mode = #tpu.pipeline_mode<synchronous>, transform_indices = @transform_3, window_bounds = array<i64: 33, 4>}, {transform_indices = @transform_4, window_bounds = array<i64: 4>}, {pipeline_mode = #tpu.pipeline_mode<synchronous>, transform_indices = @transform_5, window_bounds = array<i64: 2, 2, 16>}, {pipeline_mode = #tpu.pipeline_mode<synchronous>, transform_indices = @transform_6, window_bounds = array<i64: 2, 16, 4>}, {pipeline_mode = #tpu.pipeline_mode<synchronous>, transform_indices = @transform_7, window_bounds = array<i64: 16, 16>}, {pipeline_mode = #tpu.pipeline_mode<synchronous>, transform_indices = @transform_8, window_bounds = array<i64: 2, 128>}, {pipeline_mode = #tpu.pipeline_mode<synchronous>, transform_indices = @transform_9, window_bounds = array<i64: 2, 8>}]} {
    %c0 = arith.constant 0 : index
    %c0_0 = arith.constant 0 : index
    %0 = vector.load %arg1[%c0, %c0_0] : memref<32x33xf32, #tpu.memory_space<vmem>>, vector<32x33xf32>
    %c0_1 = arith.constant 0 : index
    %c0_2 = arith.constant 0 : index
    %1 = vector.load %arg2[%c0_1, %c0_2] : memref<33x32xf32, #tpu.memory_space<vmem>>, vector<33x32xf32>
    %cst = arith.constant dense<0.000000e+00> : vector<32x32xf32>
    %2 = tpu.matmul %0, %1, %cst {dimension_numbers = #tpu.dot_dimension_numbers<[1], [0], [0], [1], [0, 0, 1, 1], [], []>} : vector<32x33xf32>, vector<33x32xf32>, vector<32x32xf32> -> vector<32x32xf32>
    %3 = math.tanh %2 : vector<32x32xf32>
    %4 = vector.shape_cast %3 : vector<32x32xf32> to vector<2x16x32xf32>
    %c0_3 = arith.constant 0 : index
    %c0_4 = arith.constant 0 : index
    %c0_5 = arith.constant 0 : index
    %5 = vector.load %arg6[%c0_3, %c0_4, %c0_5] : memref<2x2x16xf32, #tpu.memory_space<vmem>>, vector<1x2x16xf32>
    %6 = vector.shape_cast %5 : vector<1x2x16xf32> to vector<2x16xf32>
    %c1 = arith.constant 1 : index
    %c0_6 = arith.constant 0 : index
    %c0_7 = arith.constant 0 : index
    %7 = vector.load %arg6[%c1, %c0_6, %c0_7] : memref<2x2x16xf32, #tpu.memory_space<vmem>>, vector<1x2x16xf32>
    %8 = vector.shape_cast %7 : vector<1x2x16xf32> to vector<2x16xf32>
    %c0_8 = arith.constant 0 : index
    %c0_9 = arith.constant 0 : index
    %c0_10 = arith.constant 0 : index
    %9 = vector.load %arg7[%c0_8, %c0_9, %c0_10] : memref<2x16x4xf32, #tpu.memory_space<vmem>>, vector<2x16x4xf32>
    %10 = vector.shape_cast %9 : vector<2x16x4xf32> to vector<2x16x4x1xf32>
    %11 = vector.shape_cast %4 : vector<2x16x32xf32> to vector<2x16x1x32xf32>
    %12 = vector.broadcast %10 : vector<2x16x4x1xf32> to vector<2x16x4x32xf32>
    %13 = vector.broadcast %11 : vector<2x16x1x32xf32> to vector<2x16x4x32xf32>
    %14 = arith.mulf %12, %13 : vector<2x16x4x32xf32>
    %cst_11 = arith.constant dense<0xFF800000> : vector<2x4x32xf32>
    %15 = vector.multi_reduction <maximumf>, %14, %cst_11 [1] : vector<2x16x4x32xf32> to vector<2x4x32xf32>
    %cst_12 = arith.constant dense<0xFF800000> : vector<2x32xf32>
    %16 = vector.multi_reduction <maximumf>, %4, %cst_12 [1] : vector<2x16x32xf32> to vector<2x32xf32>
    %c0_13 = arith.constant 0 : index
    %c0_14 = arith.constant 0 : index
    %17 = vector.load %arg3[%c0_13, %c0_14] : memref<8x32xf32, #tpu.memory_space<vmem>>, vector<8x32xf32>
    %18 = vector.shape_cast %17 : vector<8x32xf32> to vector<1x8x32xf32>
    %19 = vector.shape_cast %18 : vector<1x8x32xf32> to vector<1x8x32xf32>
    %20 = vector.broadcast %19 : vector<1x8x32xf32> to vector<2x8x32xf32>
    "tpu.trace_start"() <{level = 10 : i32, message = "bod,bsd->bos"}> : () -> ()
    %cst_15 = arith.constant dense<0.000000e+00> : vector<2x8x16xf32>
    %21 = tpu.matmul %20, %4, %cst_15 {dimension_numbers = #tpu.dot_dimension_numbers<[2], [2], [1], [1], [0, 0, 0, 1, 1, 1], [0], [0]>} : vector<2x8x32xf32>, vector<2x16x32xf32>, vector<2x8x16xf32> -> vector<2x8x16xf32>
    "tpu.trace_stop"() : () -> ()
    "tpu.trace_start"() <{level = 10 : i32, message = "bod,bnd->bon"}> : () -> ()
    %cst_16 = arith.constant dense<0.000000e+00> : vector<2x8x4xf32>
    %22 = tpu.matmul %20, %15, %cst_16 {dimension_numbers = #tpu.dot_dimension_numbers<[2], [2], [1], [1], [0, 0, 0, 1, 1, 1], [0], [0]>} : vector<2x8x32xf32>, vector<2x4x32xf32>, vector<2x8x4xf32> -> vector<2x8x4xf32>
    "tpu.trace_stop"() : () -> ()
    %cst_17 = arith.constant 1.000000e+00 : f32
    %23 = vector.broadcast %cst_17 : f32 to vector<2x16xf32>
    %24 = arith.subf %23, %6 : vector<2x16xf32>
    %cst_18 = arith.constant 1.000000e+30 : f32
    %25 = vector.broadcast %cst_18 : f32 to vector<2x16xf32>
    %26 = arith.mulf %25, %24 : vector<2x16xf32>
    %27 = vector.extract_strided_slice %21 {offsets = [0, 0, 0], sizes = [2, 1, 16], strides = [1, 1, 1]} : vector<2x8x16xf32> to vector<2x1x16xf32>
    %28 = vector.shape_cast %27 : vector<2x1x16xf32> to vector<2x16xf32>
    %c0_19 = arith.constant 0 : index
    %29 = memref.load %arg5[%c0_19] : memref<4xf32, #tpu.memory_space<smem>>
    %30 = vector.broadcast %29 : f32 to vector<2x16xf32>
    %31 = arith.addf %28, %30 : vector<2x16xf32>
    %32 = arith.subf %31, %26 : vector<2x16xf32>
    %33 = vector.extract_strided_slice %21 {offsets = [0, 1, 0], sizes = [2, 1, 16], strides = [1, 1, 1]} : vector<2x8x16xf32> to vector<2x1x16xf32>
    %34 = vector.shape_cast %33 : vector<2x1x16xf32> to vector<2x16xf32>
    %c1_20 = arith.constant 1 : index
    %35 = memref.load %arg5[%c1_20] : memref<4xf32, #tpu.memory_space<smem>>
    %36 = vector.broadcast %35 : f32 to vector<2x16xf32>
    %37 = arith.addf %34, %36 : vector<2x16xf32>
    %38 = arith.subf %37, %26 : vector<2x16xf32>
    %39 = vector.extract_strided_slice %22 {offsets = [0, 2, 0], sizes = [2, 1, 4], strides = [1, 1, 1]} : vector<2x8x4xf32> to vector<2x1x4xf32>
    %40 = vector.shape_cast %39 : vector<2x1x4xf32> to vector<2x4xf32>
    %c2 = arith.constant 2 : index
    %41 = memref.load %arg5[%c2] : memref<4xf32, #tpu.memory_space<smem>>
    %42 = vector.broadcast %41 : f32 to vector<2x4xf32>
    %43 = arith.addf %40, %42 : vector<2x4xf32>
    %cst_21 = arith.constant 1.000000e+00 : f32
    %44 = vector.broadcast %cst_21 : f32 to vector<2x1xf32>
    %45 = tpu.concatenate %16, %44 in 1 : vector<2x32xf32>, vector<2x1xf32> -> vector<2x33xf32>
    %c0_22 = arith.constant 0 : index
    %c0_23 = arith.constant 0 : index
    %46 = vector.load %arg4[%c0_22, %c0_23] : memref<33x4xf32, #tpu.memory_space<vmem>>, vector<33x4xf32>
    %cst_24 = arith.constant dense<0.000000e+00> : vector<2x4xf32>
    %47 = tpu.matmul %45, %46, %cst_24 {dimension_numbers = #tpu.dot_dimension_numbers<[1], [0], [0], [1], [0, 0, 1, 1], [], []>} : vector<2x33xf32>, vector<33x4xf32>, vector<2x4xf32> -> vector<2x4xf32>
    %cst_25 = arith.constant 1.000000e+30 : f32
    %48 = vector.broadcast %cst_25 : f32 to vector<2x16xf32>
    %49 = arith.mulf %48, %8 : vector<2x16xf32>
    %50 = arith.subf %32, %49 : vector<2x16xf32>
    %51 = vector.shape_cast %50 : vector<2x16xf32> to vector<2x16x1xf32>
    %52 = vector.shape_cast %38 : vector<2x16xf32> to vector<2x1x16xf32>
    %53 = vector.broadcast %51 : vector<2x16x1xf32> to vector<2x16x16xf32>
    %54 = vector.broadcast %52 : vector<2x1x16xf32> to vector<2x16x16xf32>
    %55 = arith.addf %53, %54 : vector<2x16x16xf32>
    %c0_26 = arith.constant 0 : index
    %c0_27 = arith.constant 0 : index
    %56 = vector.load %arg8[%c0_26, %c0_27] : memref<16x16xf32, #tpu.memory_space<vmem>>, vector<16x16xf32>
    %57 = vector.shape_cast %56 : vector<16x16xf32> to vector<1x16x16xf32>
    %58 = vector.broadcast %57 : vector<1x16x16xf32> to vector<2x16x16xf32>
    %59 = arith.addf %55, %58 : vector<2x16x16xf32>
    %cst_28 = arith.constant dense<0xFF800000> : vector<2x16xf32>
    %60 = vector.multi_reduction <maximumf>, %59, %cst_28 [2] : vector<2x16x16xf32> to vector<2x16xf32>
    %cst_29 = arith.constant dense<0xFF800000> : vector<2xf32>
    %61 = vector.multi_reduction <maximumf>, %60, %cst_29 [1] : vector<2x16xf32> to vector<2xf32>
    %62 = vector.shape_cast %61 : vector<2xf32> to vector<2x1xf32>
    %63 = tpu.iota {dimensions = array<i32: 1>} : vector<2x16xi32>
    %64 = vector.broadcast %62 : vector<2x1xf32> to vector<2x16xf32>
    %65 = arith.cmpf oeq, %60, %64 : vector<2x16xf32>
    %c2147483647_i32 = arith.constant 2147483647 : i32
    %66 = vector.broadcast %c2147483647_i32 : i32 to vector<2x16xi32>
    %67 = arith.select %65, %63, %66 : vector<2x16xi1>, vector<2x16xi32>
    %cst_30 = arith.constant dense<2147483647> : vector<2xi32>
    %68 = vector.multi_reduction <minsi>, %67, %cst_30 [1] : vector<2x16xi32> to vector<2xi32>
    %cst_31 = arith.constant dense<0xFF800000> : vector<2x16xf32>
    %69 = vector.multi_reduction <maximumf>, %59, %cst_31 [1] : vector<2x16x16xf32> to vector<2x16xf32>
    %cst_32 = arith.constant dense<0xFF800000> : vector<2xf32>
    %70 = vector.multi_reduction <maximumf>, %69, %cst_32 [1] : vector<2x16xf32> to vector<2xf32>
    %71 = vector.shape_cast %70 : vector<2xf32> to vector<2x1xf32>
    %72 = tpu.iota {dimensions = array<i32: 1>} : vector<2x16xi32>
    %73 = vector.broadcast %71 : vector<2x1xf32> to vector<2x16xf32>
    %74 = arith.cmpf oeq, %69, %73 : vector<2x16xf32>
    %c2147483647_i32_33 = arith.constant 2147483647 : i32
    %75 = vector.broadcast %c2147483647_i32_33 : i32 to vector<2x16xi32>
    %76 = arith.select %74, %72, %75 : vector<2x16xi1>, vector<2x16xi32>
    %cst_34 = arith.constant dense<2147483647> : vector<2xi32>
    %77 = vector.multi_reduction <minsi>, %76, %cst_34 [1] : vector<2x16xi32> to vector<2xi32>
    %cst_35 = arith.constant 0.000000e+00 : f32
    %78 = vector.broadcast %cst_35 : f32 to vector<2x88xf32>
    %79 = tpu.concatenate %32, %38, %47, %43, %78 in 1 : vector<2x16xf32>, vector<2x16xf32>, vector<2x4xf32>, vector<2x4xf32>, vector<2x88xf32> -> vector<2x128xf32>
    %c0_36 = arith.constant 0 : index
    %c0_37 = arith.constant 0 : index
    %80 = vector.load %arg9[%c0_36, %c0_37] : memref<2x128xf32, #tpu.memory_space<vmem>>, vector<2x128xf32>
    tpu.vector_store %arg9[%c0_36, %c0_37], %79 {strides = array<i32>} : memref<2x128xf32, #tpu.memory_space<vmem>>, vector<2x128xf32>,
    %81 = vector.shape_cast %68 : vector<2xi32> to vector<2x1xi32>
    %82 = vector.shape_cast %77 : vector<2xi32> to vector<2x1xi32>
    %c0_i32 = arith.constant 0 : i32
    %83 = vector.broadcast %c0_i32 : i32 to vector<2x6xi32>
    %84 = tpu.concatenate %81, %82, %83 in 1 : vector<2x1xi32>, vector<2x1xi32>, vector<2x6xi32> -> vector<2x8xi32>
    %c0_38 = arith.constant 0 : index
    %c0_39 = arith.constant 0 : index
    %85 = vector.load %arg10[%c0_38, %c0_39] : memref<2x8xi32, #tpu.memory_space<vmem>>, vector<2x8xi32>
    tpu.vector_store %arg10[%c0_38, %c0_39], %84 {strides = array<i32>} : memref<2x8xi32, #tpu.memory_space<vmem>>, vector<2x8xi32>,
    return
  }
  func.func @transform_0(%arg0: i32) -> (i32, i32) {
    %c0_i32 = arith.constant 0 : i32
    %c0_i32_0 = arith.constant 0 : i32
    %c0_i32_1 = arith.constant 0 : i32
    return %c0_i32, %c0_i32_0 : i32, i32
  }
  func.func @transform_1(%arg0: i32) -> (i32, i32) {
    %c0_i32 = arith.constant 0 : i32
    %c0_i32_0 = arith.constant 0 : i32
    %c0_i32_1 = arith.constant 0 : i32
    return %c0_i32, %c0_i32_0 : i32, i32
  }
  func.func @transform_2(%arg0: i32) -> (i32, i32) {
    %c0_i32 = arith.constant 0 : i32
    %c0_i32_0 = arith.constant 0 : i32
    %c0_i32_1 = arith.constant 0 : i32
    return %c0_i32, %c0_i32_0 : i32, i32
  }
  func.func @transform_3(%arg0: i32) -> (i32, i32) {
    %c0_i32 = arith.constant 0 : i32
    %c0_i32_0 = arith.constant 0 : i32
    %c0_i32_1 = arith.constant 0 : i32
    return %c0_i32, %c0_i32_0 : i32, i32
  }
  func.func @transform_4(%arg0: i32) -> i32 {
    %c0_i32 = arith.constant 0 : i32
    %c0_i32_0 = arith.constant 0 : i32
    return %c0_i32 : i32
  }
  func.func @transform_5(%arg0: i32) -> (i32, i32, i32) {
    %c0_i32 = arith.constant 0 : i32
    %c0_i32_0 = arith.constant 0 : i32
    %c0_i32_1 = arith.constant 0 : i32
    %c0_i32_2 = arith.constant 0 : i32
    return %c0_i32, %c0_i32_0, %c0_i32_1 : i32, i32, i32
  }
  func.func @transform_6(%arg0: i32) -> (i32, i32, i32) {
    %c0_i32 = arith.constant 0 : i32
    %c0_i32_0 = arith.constant 0 : i32
    %c0_i32_1 = arith.constant 0 : i32
    %c0_i32_2 = arith.constant 0 : i32
    return %c0_i32, %c0_i32_0, %c0_i32_1 : i32, i32, i32
  }
  func.func @transform_7(%arg0: i32) -> (i32, i32) {
    %c0_i32 = arith.constant 0 : i32
    %c0_i32_0 = arith.constant 0 : i32
    %c0_i32_1 = arith.constant 0 : i32
    return %c0_i32, %c0_i32_0 : i32, i32
  }
  func.func @transform_8(%arg0: i32) -> (i32, i32) {
    %c0_i32 = arith.constant 0 : i32
    %c0_i32_0 = arith.constant 0 : i32
    %c0_i32_1 = arith.constant 0 : i32
    return %c0_i32, %c0_i32_0 : i32, i32
  }
  func.func @transform_9(%arg0: i32) -> (i32, i32) {
    %c0_i32 = arith.constant 0 : i32
    %c0_i32_0 = arith.constant 0 : i32
    %c0_i32_1 = arith.constant 0 : i32
    return %c0_i32, %c0_i32_0 : i32, i32
  }
}

</mosaic_0001>

<bundles_post_ra>
// kernel: tpu_custom_call.1
= control target key start
LH: loop header
LB: loop body
LE: loop exit
PB: predicated region body
PF: predicated region fallthrough
CT: control target
= control target key end

     0   :  { %15 = vsyncpa [#allocation4], 0  ;;  %s1431_s0 = inlined_call_operand.vmem [shape: f32[32,33], index: 0, kind: input, shape index: {}]   ;;  %s1432_s1 = inlined_call_operand.vmem [shape: f32[33,32], index: 1, kind: input, shape index: {}]   ;;  %s1433_s2 = inlined_call_operand.vmem [shape: f32[8,32], index: 2, kind: input, shape index: {}]   ;;  %s1434_s3 = inlined_call_operand.vmem [shape: f32[33,4], index: 3, kind: input, shape index: {}]   ;;  %s1435_s4 = inlined_call_operand.vmem [shape: f32[4], index: 4, kind: input, shape index: {}]   ;;  %s1436_s5 = inlined_call_operand.vmem [shape: f32[2,2,16], index: 5, kind: input, shape index: {}]   ;;  %s1437_s6 = inlined_call_operand.vmem [shape: f32[2,16,4], index: 6, kind: input, shape index: {}]   ;;  %s1438_s7 = inlined_call_operand.vmem [shape: f32[16,16], index: 7, kind: input, shape index: {}]   ;;  %s1439_s8 = inlined_call_operand.hbm [shape: f32[2,128], index: 8, kind: output, shape index: {0}]   ;;  %s1440_s9 = inlined_call_operand.hbm [shape: s32[2,8], index: 9, kind: output, shape index: {1}]  }
   0x1   :  { %16 = vsyncpa [#allocation3], 0 }
   0x2   :  { %17 = vsyncpa [#allocation7], 0  ;;  %s31_s11 = sshll.u32 %s1435_s4, 4  ;;  %s1075_s12 = smov [#allocation2]   ;;  %s32_s11 = int_to_ptr.vmem [resolvable:$true] %s31_s11 }
   0x3   :  { %34 = dma.vmem_to_smem %s32_s11, 16, %s1075_s12, [#allocation4]  }
   0x4   :  { %1069 = dma.done.wait [#allocation4], 16  }
   0x5   :  { %1070 = vsyncadd [#allocation4], 4294967280 }
   0x6   :  { %45 = sfence }
   0x7   :  { %v54_v0 = vld [vmem:[%s1432_s1 + $0x20] sm:$0x1]  ;;  %vm68_vm0 = vcmask 1040384   ;;  %v53_v1 = vld [vmem:[%s1432_s1 + $0x18] sm:$0xff]  ;;  %v113_v2 = vlaneseq  ;;  %v52_v4 = vld [vmem:[%s1432_s1 + $0x10] sm:$0xff]  ;;  %vm55_vm1 = vcmask 269312  }
   0x8   :  { %958 = vmatpush.msk.msra.mxu0 %vm68_vm0, %v54_v0  ;;  %978 = vmatpush.msk.msra.mxu2 %vm68_vm0, %v54_v0  ;;  %v51_v5 = vld [vmem:[%s1432_s1 + $0x8] sm:$0xff]  ;;  %v108_v6 = vld [vmem:[%s1437_s6] sm:$0xff]  ;;  %v48_v9 = vld [vmem:[%s1431_s0 + $0x10] sm:$0xff]  ;;  %vm464_vm2 = vcmask 257024   ;;  %vm527_vm3 = vcmask 261120   ;;  %vm670_vm4 = vcmask 1041409  }
   0x9   :  { %v1144_v3 = vshrl.u32 %v113_v2, 7  ;;  %v50_v7 = vld [vmem:[%s1432_s1] sm:$0xff]  ;;  %v140_v10 = vperm.slane %v108_v6, 4  ;;  %v126_v11 = vperm.slane %v108_v6, 2  ;;  %v112_v12 = vperm.slane %v108_v6, 0  ;;  %v47_v13 = vld [vmem:[%s1431_s0 + $0x8] sm:$0xff] }
   0xa   :  { %84 = vmatpush.msra.mxu0 %v53_v1  ;;  %979 = vmatpush.msra.mxu2 %v53_v1  ;;  %v46_v8 = vld [vmem:[%s1431_s0] sm:$0xff]  ;;  %v49_v14 = vld [vmem:[%s1431_s0 + $0x18] sm:$0xff]  ;;  %v147_v15 = vperm.slane %v108_v6, 5  ;;  %v133_v16 = vperm.slane %v108_v6, 3  ;;  %v119_v17 = vperm.slane %v108_v6, 1  ;;  %v109_v18 = vld [vmem:[%s1437_s6 + $0x8] sm:$0xff] }
   0xb   :  { %992 = vset.pattern.permute.xlu2 %v1144_v3  ;;  %991 = vset.pattern.permute.xlu1 %v1144_v3  ;;  %v168_v19 = vperm.slane %v109_v18, 0  ;;  %v161_v20 = vperm.slane %v108_v6, 7  ;;  %v154_v21 = vperm.slane %v108_v6, 6  ;;  %v110_v22 = vld [vmem:[%s1437_s6 + $0x10] sm:$0xff]  ;;  %v182_v23 = vperm.slane %v109_v18, 2  ;;  %s974_s25 = sld [smem:[#allocation2 + $0x1]] }
   0xc   :  { %990 = vset.pattern.permute.xlu0 %v1144_v3  ;;  %85 = vmatpush.msra.mxu0 %v52_v4  ;;  %v224_v24 = vperm.slane %v110_v22, 0  ;;  %v175_v25 = vperm.slane %v109_v18, 1  ;;  %v231_v26 = vperm.slane %v110_v22, 1  ;;  %v245_v27 = vperm.slane %v110_v22, 3  ;;  %s1078_s10 = smov 32   ;;  %s975_s11 = sld [smem:[#allocation2 + $0x2]] }
   0xd   :  { %980 = vmatpush.msra.mxu2 %v52_v4  ;;  %v189_v28 = vperm.slane %v109_v18, 3  ;;  %v196_v29 = vperm.slane %v109_v18, 4  ;;  %v252_v30 = vperm.slane %v110_v22, 4  ;;  %v238_v31 = vperm.slane %v110_v22, 2  ;;  %s1079_s0 = smov 36   ;;  %s1080_s12 = smov [#allocation6]  }
   0xe   :  { %86 = vmatpush.msra.mxu0 %v51_v5  ;;  %v259_v32 = vperm.slane %v110_v22, 5  ;;  %v217_v33 = vperm.slane %v109_v18, 7  ;;  %v203_v34 = vperm.slane %v109_v18, 5  ;;  %v266_v35 = vperm.slane %v110_v22, 6  ;;  %s941_s13 = sshll.u32 %s1080_s12, 4  ;;  %s943_s16 = sshll.u32 %s1440_s9, 4  ;;  %s942_s13 = int_to_ptr.vmem [resolvable:$true] %s941_s13  ;;  %s944_s16 = int_to_ptr.hbm [resolvable:$true] %s943_s16 }
   0xf   :  { %981 = vmatpush.msra.mxu2 %v51_v5  ;;  %v210_v36 = vperm.slane %v109_v18, 6  ;;  %v1184_v37 = vadd.s32 8, %v1144_v3  ;;  %v273_v38 = vperm.slane %v110_v22, 7  ;;  %vm750_vm5 = vcmask 130048   ;;  %s1081_s4 = smov [#allocation5]   ;;  %s932_s19 = sshll.u32 %s1439_s8, 4  ;;  %s933_s19 = int_to_ptr.hbm [resolvable:$true] %s932_s19 }
  0x10   :  { %87 = vmatpush.msra.mxu0 %v50_v7  ;;  %vm772_vm6 = vcmask 130112   ;;  %vm779_vm7 = vcmask 123904   ;;  %s930_s17 = sshll.u32 %s1081_s4, 4  ;;  %s931_s17 = int_to_ptr.vmem [resolvable:$true] %s930_s17 }
  0x11   :  { %982 = vmatpush.msra.mxu2 %v50_v7  ;;  %959 = vmatmul.msk.f32.vlgmr.msra.gmra.mxu0 %vm55_vm1, %v46_v8 }
  0x12   :  { %961 = vmatmul.msk.f32.vlgmr.msra.gmra.mxu2 %vm55_vm1, %v48_v9 }
  0x13   :  { %145 = vperm.xlu2 %992, %v140_v10   ;;  %131 = vperm.xlu1 %991, %v126_v11  }
  0x14   :  { %117 = vperm.xlu0 %990, %v112_v12  }
  0x19   :  { %960 = vmatmul.msk.f32.gmra.mxu0 %vm55_vm1, %v47_v13 }
  0x1a   :  { %962 = vmatmul.msk.f32.gmra.mxu2 %vm55_vm1, %v49_v14 }
  0x1b   :  { %152 = vperm.xlu2 %992, %v147_v15   ;;  %138 = vperm.xlu1 %991, %v133_v16  }
  0x1c   :  { %124 = vperm.xlu0 %990, %v119_v17  }
  0x23   :  { %173 = vperm.xlu2 %992, %v168_v19   ;;  %166 = vperm.xlu1 %991, %v161_v20  }
  0x24   :  { %159 = vperm.xlu0 %990, %v154_v21  }
  0x2b   :  { %187 = vperm.xlu2 %992, %v182_v23   ;;  %229 = vperm.xlu1 %991, %v224_v24  }
  0x2c   :  { %180 = vperm.xlu0 %990, %v175_v25  }
  0x33   :  { %236 = vperm.xlu2 %992, %v231_v26   ;;  %250 = vperm.xlu1 %991, %v245_v27  }
  0x34   :  { %194 = vperm.xlu0 %990, %v189_v28  }
  0x3b   :  { %201 = vperm.xlu2 %992, %v196_v29   ;;  %257 = vperm.xlu1 %991, %v252_v30  }
  0x3c   :  { %243 = vperm.xlu0 %990, %v238_v31  }
  0x43   :  { %264 = vperm.xlu2 %992, %v259_v32   ;;  %222 = vperm.xlu1 %991, %v217_v33  }
  0x44   :  { %208 = vperm.xlu0 %990, %v203_v34  }
  0x4b   :  { %271 = vperm.xlu2 %992, %v266_v35  }
  0x4c   :  { %215 = vperm.xlu0 %990, %v210_v36  }
  0x53   :  { %993 = vset.pattern.permute.xlu2 %v1184_v37 }
  0x54   :  { %278 = vperm.xlu0 %990, %v273_v38  }
  0x6d   :  { %v146_v39 = vpop.permute.xlu2 %145 }
  0x75   :  { %v153_v40 = vpop.permute.xlu2 %152 }
  0x7d   :  { %v1187_v41 = vpop.permute.xlu2 %173 }
  0x85   :  { %v1189_v42 = vpop.permute.xlu2 %187  ;;  %v132_v43 = vpop.permute.xlu1 %131 }
  0x86   :  { %v118_v44 = vpop.permute.xlu0 %117 }
  0x8d   :  { %v237_v45 = vpop.permute.xlu2 %236  ;;  %v139_v46 = vpop.permute.xlu1 %138 }
  0x8e   :  { %v125_v47 = vpop.permute.xlu0 %124  ;;  %v89_v48 = vpop.f32.mrf.mxu0 }
  0x8f   :  { %1001 = vtanh.f32 %v89_v48 }
  0x95   :  { %v1191_v49 = vpop.eup %1001  ;;  %v95_v50 = vpop.f32.mrf.mxu2 }
  0x96   :  { %1003 = vtanh.f32 %v95_v50  ;;  %v167_v51 = vpop.permute.xlu1 %166  ;;  %v340_v52 = vrot.slane %v1191_v49, 1  ;;  %v342_v53 = vrot.slane %v1191_v49, 3  ;;  %v160_v54 = vpop.permute.xlu0 %159  ;;  %v341_v56 = vrot.slane %v1191_v49, 2  ;;  %v678_v50 = vld [vmem:[%s1434_s3 + $0x20] sm:$0x1] }
  0x97   :  { %v1195_v55 = vpop.permute.xlu2 %201  ;;  %v344_v57 = vrot.slane %v1191_v49, 5  ;;  %v343_v58 = vrot.slane %v1191_v49, 4  ;;  %v368_v61 = vperm.slane %v1191_v49, 0  ;;  %v92_v63 = vpop.f32.mrf.mxu0  ;;  %v346_v1 = vrot.slane %v1191_v49, 7 }
  0x98   :  { %v369_v59 = vperm.slane %v340_v52, 0  ;;  %v371_v60 = vperm.slane %v342_v53, 0  ;;  %v370_v62 = vperm.slane %v341_v56, 0  ;;  %v345_v5 = vrot.slane %v1191_v49, 6 }
  0x99   :  { %v373_v4 = vperm.slane %v344_v57, 0  ;;  %v372_v6 = vperm.slane %v343_v58, 0  ;;  %1005 = vtanh.f32 %v92_v63  ;;  %v432_v13 = vmul.f32 %v368_v61, %v118_v44 }
  0x9a   :  { %v433_v8 = vmul.f32 %v369_v59, %v125_v47  ;;  %v435_v9 = vmul.f32 %v371_v60, %v139_v46  ;;  %v434_v14 = vmul.f32 %v370_v62, %v132_v43  ;;  %v375_v18 = vperm.slane %v346_v1, 0  ;;  %v1249_v59 = vld [vmem:[%s1433_s2] sm:$0xff] }
  0x9b   :  { %v374_v19 = vperm.slane %v345_v5, 0  ;;  %v437_v23 = vmul.f32 %v373_v4, %v153_v40  ;;  %v436_v24 = vmul.f32 %v372_v6, %v146_v39  ;;  %v465_v29 = vsel %vm464_vm2, %v432_v13, -inf  ;;  %v676_v13 = vld [vmem:[%s1434_s3 + $0x10] sm:$0xff] }
  0x9c   :  { %v1201_v0 = vpop.eup %1003  ;;  %v466_v27 = vsel %vm464_vm2, %v433_v8, -inf  ;;  %v469_v28 = vsel %vm464_vm2, %v435_v9, -inf  ;;  %v467_v30 = vsel %vm464_vm2, %v434_v14, -inf  ;;  %v439_v34 = vmul.f32 %v375_v18, %v167_v51 }
  0x9d   :  { %v98_v7 = vpop.f32.mrf.mxu2  ;;  %v358_v10 = vrot.slane %v1201_v0, 5  ;;  %v384_v15 = vperm.slane %v1201_v0, 0  ;;  %v354_v17 = vrot.slane %v1201_v0, 1  ;;  %v356_v22 = vrot.slane %v1201_v0, 3 }
  0x9e   :  { %v230_v11 = vpop.permute.xlu1 %229  ;;  %v1206_v12 = vpop.permute.xlu0 %180  ;;  %1007 = vtanh.f32 %v98_v7  ;;  %v438_v35 = vmul.f32 %v374_v19, %v160_v54  ;;  %v470_v38 = vmax.f32 %v466_v27, %v469_v28  ;;  %v473_v39 = vsel %vm464_vm2, %v437_v23, -inf }
  0x9f   :  { %v389_v16 = vperm.slane %v358_v10, 0  ;;  %v265_v20 = vpop.permute.xlu2 %264  ;;  %v1210_v21 = vmul.f32 %v384_v15, %v230_v11  ;;  %v385_v26 = vperm.slane %v354_v17, 0  ;;  %v1217_v31 = vpop.eup %1005  ;;  %v387_v36 = vperm.slane %v356_v22, 0 }
  0xa0   :  { %964 = vmatpush.xpose.msk.msra.mxu1 %vm527_vm3, %v1217_v31  ;;  %v468_v40 = vmax.f32 %v465_v29, %v467_v30  ;;  %v471_v46 = vsel %vm464_vm2, %v436_v24, -inf  ;;  %v359_v47 = vrot.slane %v1201_v0, 6  ;;  %v528_v51 = vsel %vm527_vm3, %v1191_v49, -inf }
  0xa1   :  { %v453_v25 = vmul.f32 %v389_v16, %v265_v20  ;;  %v449_v32 = vmul.f32 %v385_v26, %v237_v45  ;;  %v529_v45 = vsel %vm527_vm3, %v1217_v31, -inf  ;;  %v357_v52 = vrot.slane %v1201_v0, 4  ;;  %v675_v26 = vld [vmem:[%s1434_s3 + $0x8] sm:$0xff] }
  0xa2   :  { %v530_v53 = vmax.f32 %v528_v51, %v529_v45  ;;  %v537_v54 = vsel %vm527_vm3, %v1201_v0, -inf  ;;  %v355_v60 = vrot.slane %v1201_v0, 2  ;;  %v1253_v62 = vsel %vm464_vm2, %v439_v34, -inf }
  0xa3   :  { %v497_v57 = vsel %vm464_vm2, %v449_v32, -inf  ;;  %v1255_v63 = vmax.f32 %v468_v40, %v471_v46  ;;  %v1263_v5 = vmax.f32 %v470_v38, %v473_v39  ;;  %v1266_v6 = vsel %vm464_vm2, %v438_v35, -inf }
  0xa4   :  { %v1219_v33 = vpop.eup %1007  ;;  %965 = vmatpush.xpose.msk.msra.mxu1 %vm527_vm3, %v1191_v49  ;;  %v677_v49 = vld [vmem:[%s1434_s3 + $0x18] sm:$0xff]  ;;  %v531_v4 = vrot.slane %v530_v53, 4  ;;  %v347_v7 = vrot.slane %v1217_v31, 1  ;;  %v390_v9 = vperm.slane %v359_v47, 0  ;;  %v349_v10 = vrot.slane %v1217_v31, 3 }
  0xa5   :  { %967 = vmatpush.xpose.msk.msra.mxu3 %vm527_vm3, %v1219_v33  ;;  %v538_v56 = vsel %vm527_vm3, %v1219_v33, -inf  ;;  %v388_v11 = vperm.slane %v357_v52, 0  ;;  %v386_v15 = vperm.slane %v355_v60, 0  ;;  %v348_v17 = vrot.slane %v1217_v31, 2 }
  0xa6   :  { %v251_v43 = vpop.permute.xlu1 %250  ;;  %v1226_v44 = vpop.permute.xlu0 %194  ;;  %v539_v61 = vmax.f32 %v537_v54, %v538_v56  ;;  %v532_v14 = vmax.f32 %v530_v53, %v531_v4  ;;  %v376_v18 = vperm.slane %v1217_v31, 0  ;;  %v476_v19 = vmax.f32 %v1255_v63, %v1266_v6 }
  0xa7   :  { %v451_v48 = vmul.f32 %v387_v36, %v251_v43  ;;  %966 = vmatmul.msk.f32.vlgmr.msra.gmra.mxu1 %vm527_vm3, %v1249_v59  ;;  %v504_v20 = vsel %vm464_vm2, %v453_v25, -inf  ;;  %v496_v22 = vsel %vm464_vm2, %v1210_v21, -inf  ;;  %v377_v28 = vperm.slane %v347_v7, 0  ;;  %v272_v29 = vpop.permute.xlu2 %271  ;;  %v674_v25 = vld [vmem:[%s1434_s3] sm:$0xff]  ;;  %s646_s3 = sld [smem:[#allocation2]] }
  0xa8   :  { %976 = vmatpush.msk.msrb.mxu1 %vm68_vm0, %v678_v50  ;;  %v540_v8 = vrot.slane %v539_v61, 4  ;;  %v533_v27 = vrot.slane %v532_v14, 2  ;;  %v379_v35 = vperm.slane %v349_v10, 0  ;;  %v351_v21 = vrot.slane %v1217_v31, 5 }
  0xa9   :  { %v500_v58 = vsel %vm464_vm2, %v451_v48, -inf  ;;  %968 = vmatpush.xpose.msk.msra.mxu3 %vm527_vm3, %v1201_v0  ;;  %v350_v38 = vrot.slane %v1217_v31, 4  ;;  %v378_v43 = vperm.slane %v348_v17, 0  ;;  %v440_v45 = vmul.f32 %v376_v18, %v1187_v41 }
  0xaa   :  { %v501_v1 = vmax.f32 %v497_v57, %v500_v58  ;;  %697 = vmatpush.msrb.mxu1 %v677_v49  ;;  %v541_v16 = vmax.f32 %v539_v61, %v540_v8  ;;  %v534_v36 = vmax.f32 %v532_v14, %v533_v27  ;;  %v454_v46 = vmul.f32 %v390_v9, %v272_v29 }
  0xab   :  { %v441_v51 = vmul.f32 %v377_v28, %v1206_v12  ;;  %v443_v54 = vmul.f32 %v379_v35, %v1226_v44  ;;  %v381_v57 = vperm.slane %v351_v21, 0  ;;  %v380_v58 = vperm.slane %v350_v38, 0 }
  0xac   :  { %969 = vmatmul.msk.f32.vlgmr.msra.gmra.mxu3 %vm527_vm3, %v1249_v59  ;;  %698 = vmatpush.msrb.mxu1 %v676_v13  ;;  %v542_v34 = vrot.slane %v541_v16, 2  ;;  %v535_v48 = vrot.slane %v534_v36, 1  ;;  %v1294_v50 = vmax.f32 %v501_v1, %v504_v20  ;;  %v442_v61 = vmul.f32 %v378_v43, %v1189_v42 }
  0xad   :  { %v479_v63 = vsel %vm464_vm2, %v440_v45, -inf  ;;  %v1304_v1 = vsel %vm464_vm2, %v454_v46, -inf  ;;  %v353_v12 = vrot.slane %v1217_v31, 7  ;;  %v481_v4 = vsel %vm464_vm2, %v441_v51, -inf  ;;  %v963_v45 = vld [vmem:[%s1436_s5 + $0x2] sm:$0x3] }
  0xae   :  { %v258_v23 = vpop.permute.xlu1 %257  ;;  %v244_v24 = vpop.permute.xlu0 %243  ;;  %699 = vmatpush.msrb.mxu1 %v675_v26  ;;  %v543_v40 = vmax.f32 %v541_v16, %v542_v34  ;;  %v536_v60 = vmax.f32 %v534_v36, %v535_v48  ;;  %v478_v8 = vmax.f32 %v1263_v5, %v1253_v62  ;;  %v480_v9 = vmax.f32 %v476_v19, %v479_v63 }
  0xaf   :  { %v452_v30 = vmul.f32 %v388_v11, %v258_v23  ;;  %v450_v32 = vmul.f32 %v386_v15, %v244_v24  ;;  %v485_v10 = vsel %vm464_vm2, %v443_v54, -inf  ;;  %v352_v11 = vrot.slane %v1217_v31, 6 }
  0xb0   :  { %700 = vmatpush.msrb.mxu1 %v674_v25  ;;  %v544_v53 = vrot.slane %v543_v40, 1  ;;  %v444_v13 = vmul.f32 %v380_v58, %v1195_v55  ;;  %v483_v14 = vsel %vm464_vm2, %v442_v61, -inf  ;;  %v482_v15 = vmax.f32 %v478_v8, %v481_v4 }
  0xb1   :  { %v498_v39 = vsel %vm464_vm2, %v450_v32, -inf  ;;  %v502_v52 = vsel %vm464_vm2, %v452_v30, -inf  ;;  %v383_v17 = vperm.slane %v353_v12, 0  ;;  %v484_v62 = vmax.f32 %v480_v9, %v483_v14 }
  0xb2   :  { %v499_v47 = vmax.f32 %v496_v22, %v498_v39  ;;  %v545_v41 = vmax.f32 %v543_v40, %v544_v53  ;;  %v486_v20 = vmax.f32 %v482_v15, %v485_v10  ;;  %v382_v22 = vperm.slane %v352_v11, 0  ;;  %v111_v11 = vld [vmem:[%s1437_s6 + $0x18] sm:$0xff] }
  0xb3   :  { %v487_v19 = vsel %vm464_vm2, %v444_v13, -inf  ;;  %v360_v28 = vrot.slane %v1201_v0, 7  ;;  %v105_v0 = vld [vmem:[%s1436_s5] sm:$0x3]  ;;  %v647_v40 = vstv %s646_s3  ;;  %v657_v43 = vstv %s974_s25 }
  0xb4   :  { %v1299_v56 = vmax.f32 %v499_v47, %v502_v52  ;;  %v671_v44 = vsel %vm670_vm4, %v545_v41, %v536_v60  ;;  %v488_v27 = vmax.f32 %v484_v62, %v487_v19  ;;  %v644_v38 = vsub.f32 1.0, %v105_v0  ;;  %v745_v19 = vld [vmem:[%s1438_s7 + $0x8] sm:$0xff] }
  0xb5   :  { %v673_v42 = vsel %vm527_vm3, %v671_v44, 1.0  ;;  %v391_v34 = vperm.slane %v360_v28, 0  ;;  %v705_v52 = vmul.f32 1e+30, %v963_v45  ;;  %v294_v13 = vperm.slane %v111_v11, 2 }
  0xb6   :  { %v209_v49 = vpop.permute.xlu0 %208  ;;  %v507_v7 = vmax.f32 %v1299_v56, %v1304_v1  ;;  %977 = vmatmul.msk.f32.vlgmr.msrb.gmra.mxu1 %vm55_vm1, %v673_v42  ;;  %v223_v16 = vpop.permute.xlu1 %222  ;;  %v645_v39 = vmul.f32 1e+30, %v644_v38  ;;  %v287_v14 = vperm.slane %v111_v11, 1  ;;  %v315_v15 = vperm.slane %v111_v11, 5 }
  0xb7   :  { %v445_v6 = vmul.f32 %v381_v57, %v209_v49  ;;  %v447_v5 = vmul.f32 %v383_v17, %v223_v16  ;;  %v707_v12 = vrot.slane %v705_v52, 1  ;;  %v308_v16 = vperm.slane %v111_v11, 4 }
  0xb8   :  { %v660_v46 = vrot.slane %v645_v39, 7  ;;  %v651_v58 = vrot.slane %v645_v39, 1  ;;  %v329_v17 = vperm.slane %v111_v11, 7  ;;  %v322_v62 = vperm.slane %v111_v11, 6 }
  0xb9   :  { %v489_v18 = vsel %vm464_vm2, %v445_v6, -inf  ;;  %v493_v31 = vsel %vm464_vm2, %v447_v5, -inf  ;;  %v366_v1 = vrot.slane %v1219_v33, 6  ;;  %vm919_vm0 = vcmask 7168  }
  0xba   :  { %v490_v23 = vmax.f32 %v486_v20, %v489_v18  ;;  %v280_v18 = vperm.slane %v111_v11, 0  ;;  %v301_v20 = vperm.slane %v111_v11, 3  ;;  %vm921_vm1 = vcmask 15360  }
  0xbc   :  { %v494_v29 = vmax.f32 %v490_v23, %v493_v31 }
  0xbe   :  { %v216_v24 = vpop.permute.xlu0 %215 }
  0xbf   :  { %v446_v26 = vmul.f32 %v382_v22, %v216_v24 }
  0xc1   :  { %v491_v55 = vsel %vm464_vm2, %v446_v26, -inf  ;;  %v361_v26 = vrot.slane %v1219_v33, 1 }
  0xc2   :  { %v492_v30 = vmax.f32 %v488_v27, %v491_v55 }
  0xc3   :  { %v393_v27 = vperm.slane %v361_v26, 0 }
  0xc4   :  { %v495_v32 = vmax.f32 %v492_v30, %v494_v29  ;;  %v744_v30 = vld [vmem:[%s1438_s7] sm:$0xff]  ;;  %s1077_s7 = smov 16  }
  0xc6   :  { %v279_v35 = vpop.permute.xlu0 %278  ;;  %970 = vmatpush.xpose.msk.msrb.mxu3 %vm527_vm3, %v495_v32 }
  0xc7   :  { %v455_v25 = vmul.f32 %v391_v34, %v279_v35  ;;  %v1364_v34 = vand.u32 127, %v113_v2 }
  0xc9   :  { %v1326_v21 = vsel %vm464_vm2, %v455_v25, -inf  ;;  %971 = vmatmul.msk.f32.vlgmr.msrb.gmra.mxu3 %vm527_vm3, %v1249_v59 }
  0xca   :  { %v509_v36 = vmax.f32 %v1294_v50, %v1326_v21 }
 0x124   :  { %v571_v47 = vpop.f32.mrf.mxu1 }
 0x125   :  { %v648_v48 = vadd.f32 %v647_v40, %v571_v47  ;;  %v658_v51 = vadd.f32 %v657_v43, %v571_v47  ;;  %v362_v47 = vrot.slane %v1219_v33, 2 }
 0x127   :  { %v654_v53 = vsub.f32 %v648_v48, %v645_v39  ;;  %v662_v54 = vsub.f32 %v658_v51, %v660_v46  ;;  %v364_v51 = vrot.slane %v1219_v33, 4 }
 0x129   :  { %v710_v57 = vsub.f32 %v654_v53, %v705_v52  ;;  %v895_v49 = vrot.slane %v662_v54, 1  ;;  %v738_v5 = vperm.slane %v662_v54, 1  ;;  %v392_v54 = vperm.slane %v1219_v33, 0 }
 0x12b   :  { %v712_v60 = vperm.slane %v710_v57, 0 }
 0x12d   :  { %723 = vperm.xlu2 %993, %v712_v60   ;;  %717 = vperm.xlu1 %991, %v712_v60  }
 0x12f   :  { %v595_v41 = vpop.f32.mrf.mxu3 }
 0x130   :  { %v649_v61 = vadd.f32 %v647_v40, %v595_v41  ;;  %v659_v63 = vadd.f32 %v657_v43, %v595_v41 }
 0x132   :  { %v655_v4 = vsub.f32 %v649_v61, %v651_v58  ;;  %v663_v6 = vsub.f32 %v659_v63, %v645_v39  ;;  %v396_v58 = vperm.slane %v364_v51, 0  ;;  %v365_v63 = vrot.slane %v1219_v33, 5 }
 0x134   :  { %v890_v44 = vrot.slane %v655_v4, 7  ;;  %v711_v8 = vsub.f32 %v655_v4, %v707_v12  ;;  %v1339_v42 = vsel %vm670_vm4, %v663_v6, %v895_v49  ;;  %v739_v38 = vperm.slane %v663_v6, 1 }
 0x135   :  { %996 = vset.pattern.permute.xlu2 %v1144_v3  ;;  %994 = vset.pattern.permute.xlu1 %v1184_v37  ;;  %v363_v49 = vrot.slane %v1219_v33, 3  ;;  %v367_v6 = vrot.slane %v1219_v33, 7 }
 0x136   :  { %v725_v9 = vperm.slane %v711_v8, 0  ;;  %v1342_v10 = vsel %vm670_vm4, %v890_v44, %v654_v53  ;;  %v394_v53 = vperm.slane %v362_v47, 0 }
 0x138   :  { %730 = vperm.xlu0 %990, %v725_v9  }
 0x13d   :  { %292 = vperm.xlu2 %996, %v287_v14   ;;  %736 = vperm.xlu1 %994, %v725_v9   ;;  %v395_v14 = vperm.slane %v363_v49, 0 }
 0x140   :  { %299 = vperm.xlu0 %990, %v294_v13   ;;  %v397_v13 = vperm.slane %v365_v63, 0 }
 0x145   :  { %313 = vperm.xlu2 %996, %v308_v16   ;;  %995 = vset.pattern.permute.xlu1 %v1144_v3 }
 0x148   :  { %320 = vperm.xlu0 %990, %v315_v15  }
 0x14d   :  { %334 = vperm.xlu2 %996, %v329_v17   ;;  %285 = vperm.xlu1 %995, %v280_v18   ;;  %v399_v18 = vperm.slane %v367_v6, 0 }
 0x155   :  { %306 = vperm.xlu1 %995, %v301_v20   ;;  %997 = vset.pattern.permute.xlu2 %v1184_v37 }
 0x15d   :  { %327 = vperm.xlu1 %995, %v322_v62  }
 0x187   :  { %v724_v22 = vpop.permute.xlu2 %723 }
 0x188   :  { %v741_v23 = vadd.f32 %v738_v5, %v724_v22 }
 0x18a   :  { %v747_v24 = vadd.f32 %v745_v19, %v741_v23 }
 0x18c   :  { %v754_v3 = vsel %vm750_vm5, %v747_v24, -inf  ;;  %v398_v24 = vperm.slane %v366_v1, 0 }
 0x18d   :  { %755 = vmax.xlane.f32.xlu1 %v754_v3 }
 0x197   :  { %v293_v31 = vpop.permute.xlu2 %292 }
 0x198   :  { %v457_v55 = vmul.f32 %v393_v27, %v293_v31 }
 0x19a   :  { %v512_v37 = vsel %vm464_vm2, %v457_v55, -inf }
 0x19b   :  { %v513_v28 = vmax.f32 %v509_v36, %v512_v37 }
 0x19f   :  { %v718_v29 = vpop.permute.xlu1 %717  ;;  %v314_v52 = vpop.permute.xlu2 %313 }
 0x1a0   :  { %v740_v32 = vadd.f32 %v738_v5, %v718_v29  ;;  %v460_v61 = vmul.f32 %v396_v58, %v314_v52 }
 0x1a2   :  { %v746_v35 = vadd.f32 %v744_v30, %v740_v32  ;;  %v518_v11 = vsel %vm464_vm2, %v460_v61, -inf }
 0x1a4   :  { %v751_v25 = vsel %vm750_vm5, %v746_v35, -inf }
 0x1a5   :  { %752 = vmax.xlane.f32.xlu0 %v751_v25  ;;  %v1367_v0 = vmax.f32 %v751_v25, %v754_v3 }
 0x1a6   :  { %796 = vperm.xlu1 %995, %v1364_v34  }
 0x1a7   :  { %v335_v15 = vpop.permute.xlu2 %334 }
 0x1a8   :  { %v463_v5 = vmul.f32 %v399_v18, %v335_v15 }
 0x1aa   :  { %v731_v50 = vpop.permute.xlu0 %730  ;;  %v524_v23 = vsel %vm464_vm2, %v463_v5, -inf }
 0x1ab   :  { %v742_v21 = vadd.f32 %v739_v38, %v731_v50  ;;  %v1396_v50 = vadd.s32 4294967288, %v1364_v34 }
 0x1ad   :  { %v748_v36 = vadd.f32 %v744_v30, %v742_v21 }
 0x1af   :  { %v757_v39 = vsel %vm750_vm5, %v748_v36, -inf  ;;  %v737_v40 = vpop.permute.xlu1 %736 }
 0x1b0   :  { %758 = vmax.xlane.f32.xlu2 %v757_v39  ;;  %v743_v43 = vadd.f32 %v739_v38, %v737_v40 }
 0x1b2   :  { %v749_v45 = vadd.f32 %v745_v19, %v743_v43  ;;  %v300_v48 = vpop.permute.xlu0 %299 }
 0x1b3   :  { %v458_v60 = vmul.f32 %v394_v53, %v300_v48 }
 0x1b4   :  { %v760_v2 = vsel %vm750_vm5, %v749_v45, -inf }
 0x1b5   :  { %v849_v46 = vmax.f32 %v757_v39, %v760_v2  ;;  %v514_v44 = vsel %vm464_vm2, %v458_v60, -inf  ;;  %v1076_v60 = vmov 0  }
 0x1b6   :  { %998 = vset.pattern.permute.xlu0 %v1076_v60  ;;  %999 = vset.pattern.permute.xlu1 %v1076_v60 }
 0x1b7   :  { %v850_v33 = vrot.slane %v849_v46, 4 }
 0x1b8   :  { %761 = vmax.xlane.f32.xlu2 %v760_v2 }
 0x1b9   :  { %v851_v29 = vmax.f32 %v849_v46, %v850_v33 }
 0x1ba   :  { %v321_v8 = vpop.permute.xlu0 %320 }
 0x1bb   :  { %v461_v20 = vmul.f32 %v397_v13, %v321_v8  ;;  %v852_v35 = vrot.slane %v851_v29, 2 }
 0x1bd   :  { %v520_v22 = vsel %vm464_vm2, %v461_v20, -inf  ;;  %v853_v21 = vmax.f32 %v851_v29, %v852_v35  ;;  %v618_v35 = vpop.f32.mrf.mxu3 }
 0x1bf   :  { %v286_v57 = vpop.permute.xlu1 %285 }
 0x1c0   :  { %v456_v41 = vmul.f32 %v392_v54, %v286_v57 }
 0x1c2   :  { %v510_v12 = vsel %vm464_vm2, %v456_v41, -inf }
 0x1c3   :  { %v511_v4 = vmax.f32 %v507_v7, %v510_v12 }
 0x1c5   :  { %v515_v9 = vmax.f32 %v511_v4, %v514_v44 }
 0x1c7   :  { %v307_v16 = vpop.permute.xlu1 %306  ;;  %v519_v17 = vmax.f32 %v515_v9, %v518_v11 }
 0x1c8   :  { %v459_v62 = vmul.f32 %v395_v14, %v307_v16 }
 0x1ca   :  { %v516_v56 = vsel %vm464_vm2, %v459_v62, -inf }
 0x1cb   :  { %v517_v7 = vmax.f32 %v513_v28, %v516_v56  ;;  %v843_v28 = vrot.slane %v1367_v0, 4 }
 0x1cd   :  { %v521_v19 = vmax.f32 %v517_v7, %v520_v22  ;;  %v844_v32 = vmax.f32 %v1367_v0, %v843_v28  ;;  %v854_v0 = vrot.slane %v853_v21, 1 }
 0x1cf   :  { %v525_v3 = vmax.f32 %v521_v19, %v524_v23  ;;  %v328_v26 = vpop.permute.xlu1 %327  ;;  %v845_v25 = vrot.slane %v844_v32, 2  ;;  %v855_v53 = vmax.f32 %v853_v21, %v854_v0 }
 0x1d0   :  { %802 = vperm.xlu2 %997, %v1364_v34   ;;  %v462_v27 = vmul.f32 %v398_v24, %v328_v26 }
 0x1d1   :  { %v846_v40 = vmax.f32 %v844_v32, %v845_v25 }
 0x1d2   :  { %v522_v31 = vsel %vm464_vm2, %v462_v27, -inf  ;;  %vm923_vm2 = vcmask 58368  }
 0x1d3   :  { %v523_v55 = vmax.f32 %v519_v17, %v522_v31  ;;  %v847_v48 = vrot.slane %v846_v40, 1 }
 0x1d5   :  { %v526_v37 = vmax.f32 %v523_v55, %v525_v3  ;;  %v848_v54 = vmax.f32 %v846_v40, %v847_v48 }
 0x1d7   :  { %972 = vmatpush.xpose.msk.msra.mxu3 %vm527_vm3, %v526_v37  ;;  %v858_v57 = vsel %vm670_vm4, %v855_v53, %v848_v54 }
 0x1d8   :  { %v860_v58 = vsel %vm779_vm7, %v858_v57, -inf  ;;  %1000 = vset.pattern.permute.xlu2 %v1076_v60 }
 0x1da   :  { %973 = vmatmul.msk.f32.vlgmr.msra.gmra.mxu3 %vm527_vm3, %v1249_v59 }
 0x200   :  { %v756_v36 = vpop.xlane.xlu1 %755 }
 0x201   :  { %v771_v59 = vperm.slane %v756_v36, %v1396_v50 }
 0x218   :  { %v753_v38 = vpop.xlane.xlu0 %752  ;;  %v797_v49 = vpop.permute.xlu1 %796 }
 0x219   :  { %v769_v39 = vperm.slane %v753_v38, %v1364_v34 }
 0x21b   :  { %v773_v46 = vsel %vm772_vm6, %v771_v59, %v769_v39 }
 0x223   :  { %v759_v30 = vpop.xlane.xlu2 %758 }
 0x224   :  { %v774_v45 = vperm.slane %v759_v30, %v1364_v34 }
 0x22b   :  { %v762_v43 = vpop.xlane.xlu2 %761 }
 0x22c   :  { %v775_v2 = vperm.slane %v762_v43, %v1396_v50 }
 0x22e   :  { %v776_v47 = vsel %vm772_vm6, %v775_v2, %v774_v45 }
 0x22f   :  { %v777_v51 = vsel %vm670_vm4, %v776_v47, %v773_v46 }
 0x230   :  { %v780_v52 = vsel %vm779_vm7, %v777_v51, -inf }
 0x231   :  { %781 = vmax.xlane.f32.xlu0 %v780_v52 }
 0x233   :  { %v803_v12 = vpop.permute.xlu2 %802 }
 0x239   :  { %861 = vmax.xlane.f32.xlu0 %v860_v58 }
 0x2a4   :  { %v782_v41 = vpop.xlane.xlu0 %781 }
 0x2a5   :  { %v784_v61 = vperm.slane %v782_v41, 0  ;;  %v785_v63 = vperm.slane %v782_v41, 1 }
 0x2a7   :  { %vm789_vm8 = vcmp.eq.f32.partialorder %v756_v36, %v784_v61  ;;  %vm790_vm9 = vcmp.eq.f32.partialorder %v759_v30, %v785_v63  ;;  %vm788_vm10 = vcmp.eq.f32.partialorder %v753_v38, %v784_v61  ;;  %vm791_vm11 = vcmp.eq.f32.partialorder %v762_v43, %v785_v63 }
 0x2a8   :  { %v805_v4 = vsel %vm789_vm8, %v803_v12, 2147483647  ;;  %v806_v6 = vsel %vm790_vm9, %v797_v49, 2147483647  ;;  %v804_v44 = vsel %vm788_vm10, %v797_v49, 2147483647  ;;  %v665_v38 = vstv %s975_s11 }
 0x2a9   :  { %812 = vperm.xlu1 %999, %v805_v4   ;;  %815 = vperm.xlu2 %1000, %v806_v6   ;;  %v807_v8 = vsel %vm791_vm11, %v803_v12, 2147483647  ;;  %v666_v21 = vadd.f32 %v665_v38, %v618_v35 }
 0x2aa   :  { %809 = vperm.xlu0 %998, %v804_v44  }
 0x2ab   :  { %v906_v39 = vrot.slane %v666_v21, 2 }
 0x2ac   :  { %v862_v9 = vpop.xlane.xlu0 %861 }
 0x2ad   :  { %v864_v11 = vrot.slane %v862_v9, 1  ;;  %vm867_vm13 = vcmp.eq.f32.partialorder %v848_v54, %v862_v9 }
 0x2ae   :  { %v869_v15 = vsel %vm867_vm13, %v1364_v34, 2147483647 }
 0x2af   :  { %vm868_vm12 = vcmp.eq.f32.partialorder %v855_v53, %v864_v11 }
 0x2b0   :  { %v870_v13 = vsel %vm868_vm12, %v1364_v34, 2147483647 }
 0x2b1   :  { %818 = vperm.xlu1 %999, %v807_v8   ;;  %v871_v14 = vrot.slane %v870_v13, 7 }
 0x2b3   :  { %v872_v16 = vsel %vm670_vm4, %v871_v14, %v869_v15 }
 0x2b4   :  { %v873_v17 = vsel %vm779_vm7, %v872_v16, 2147483647 }
 0x2b5   :  { %v875_v18 = vshra.s32 %v873_v17, 16  ;;  %v874_v55 = vand.u32 65535, %v873_v17 }
 0x2b7   :  { %v877_v20 = vcvt.s32.f32 %v875_v18  ;;  %v876_v33 = vcvt.s32.f32 %v874_v55 }
 0x2db   :  { %878 = vmin.xlane.f32.xlu1 %v877_v20 }
 0x2f4   :  { %897 = vrot.lane.b32.xlu1 %v1339_v42, %s1077_s7 }
 0x303   :  { %v816_v56 = vpop.permute.xlu2 %815 }
 0x304   :  { %v823_v19 = vperm.slane %v816_v56, %v1364_v34 }
 0x31b   :  { %v813_v62 = vpop.permute.xlu1 %812 }
 0x31c   :  { %v810_v5 = vpop.permute.xlu0 %809  ;;  %v821_v7 = vperm.slane %v813_v62, %v1396_v50 }
 0x31d   :  { %v820_v1 = vperm.slane %v810_v5, %v1364_v34  ;;  %v702_v34 = vpop.f32.mrf.mxu1 }
 0x31f   :  { %v822_v24 = vsel %vm772_vm6, %v821_v7, %v820_v1 }
 0x323   :  { %v819_v22 = vpop.permute.xlu1 %818 }
 0x324   :  { %v824_v23 = vperm.slane %v819_v22, %v1396_v50  ;;  %v641_v50 = vpop.f32.mrf.mxu3 }
 0x325   :  { %v667_v36 = vadd.f32 %v665_v38, %v641_v50 }
 0x326   :  { %v825_v3 = vsel %vm772_vm6, %v824_v23, %v823_v19  ;;  %vm916_vm6 = vcmask 326656  }
 0x327   :  { %v826_v26 = vsel %vm670_vm4, %v825_v3, %v822_v24  ;;  %v907_v40 = vrot.slane %v667_v36, 1 }
 0x328   :  { %v827_v42 = vsel %vm779_vm7, %v826_v26, 2147483647 }
 0x329   :  { %v829_v27 = vshra.s32 %v827_v42, 16  ;;  %v828_v29 = vand.u32 65535, %v827_v42  ;;  %v908_v43 = vsel %vm670_vm4, %v907_v40, %v906_v39  ;;  %vm914_vm4 = vcmask 293888  }
 0x32b   :  { %v831_v31 = vcvt.s32.f32 %v829_v27  ;;  %v830_v32 = vcvt.s32.f32 %v828_v29 }
 0x32d   :  { %832 = vmin.xlane.f32.xlu2 %v831_v31 }
 0x34e   :  { %v879_v37 = vpop.xlane.xlu1 %878 }
 0x34f   :  { %vm880_vm14 = vcmp.eq.f32.partialorder %v877_v20, %v879_v37  ;;  %v885_v45 = vcvt.f32.s32 %v879_v37 }
 0x350   :  { %v881_v28 = vsel %vm880_vm14, %v876_v33, inf }
 0x351   :  { %882 = vmin.xlane.f32.xlu2 %v881_v28  ;;  %v886_v47 = vshll.u32 %v885_v45, 16 }
 0x366   :  { %v898_v58 = vpop.permute.xlu1 %897 }
 0x367   :  { %v912_v41 = vsel %vm750_vm5, %v1342_v10, %v898_v58 }
 0x369   :  { %901 = vrot.lane.b32.xlu2 %v702_v34, %s1078_s10 }
 0x3a0   :  { %v833_v30 = vpop.xlane.xlu2 %832 }
 0x3a1   :  { %vm834_vm15 = vcmp.eq.f32.partialorder %v831_v31, %v833_v30  ;;  %v839_v2 = vcvt.f32.s32 %v833_v30 }
 0x3a2   :  { %v835_v25 = vsel %vm834_vm15, %v830_v32, inf }
 0x3a3   :  { %836 = vmin.xlane.f32.xlu0 %v835_v25  ;;  %v840_v48 = vshll.u32 %v839_v2, 16 }
 0x3b7   :  { %909 = vrot.lane.b32.xlu0 %v908_v43, %s1079_s0 }
 0x3c4   :  { %v883_v59 = vpop.xlane.xlu2 %882 }
 0x3c5   :  { %v884_v0 = vcvt.f32.s32 %v883_v59 }
 0x3c7   :  { %v887_v52 = vadd.s32 %v886_v47, %v884_v0 }
 0x3cc   :  { %v902_v60 = vpop.permute.xlu2 %901 }
 0x3cd   :  { %v913_v61 = vsel %vm527_vm3, %v912_v41, %v902_v60 }
 0x416   :  { %v837_v46 = vpop.xlane.xlu0 %836 }
 0x417   :  { %v838_v51 = vcvt.f32.s32 %v837_v46 }
 0x419   :  { %v841_v53 = vadd.s32 %v840_v48, %v838_v51 }
 0x41b   :  { %v920_v54 = vsel %vm919_vm0, %v841_v53, %v887_v52 }
 0x41c   :  { %v922_v57 = vsel %vm921_vm1, %v920_v54, 0 }
 0x41d   :  { %924 = vst.msk [vmem:[#allocation6] sm:$0x3] %vm923_vm2, %v922_v57 }
 0x41e   :  { %946 = dma.vmem_to_hbm [thread:$0]  %s942_s13, 32, %s944_s16, [#allocation7]  }
 0x429   :  { %v910_v63 = vpop.permute.xlu0 %909 }
 0x42a   :  { %v915_v12 = vsel %vm914_vm4, %v913_v61, %v910_v63 }
 0x42b   :  { %v917_v49 = vsel %vm916_vm6, %v915_v12, 0.0 }
 0x42c   :  { %918 = vst [vmem:[#allocation5] sm:$0x3] %v917_v49 }
 0x42d   :  { %935 = dma.vmem_to_hbm [thread:$0]  %s931_s17, 32, %s933_s19, [#allocation3]  }
 0x42e   :  { %1071 = dma.done.wait [#allocation3], 32  }
 0x42f   :  { %1072 = vsyncadd [#allocation3], 4294967264 }
 0x430   :  { %1073 = dma.done.wait [#allocation7], 32  }
 0x431   :  { %1074 = vsyncadd [#allocation7], 4294967264 }
 0x432   :  { %955 = vsyncpa [#allocation3], 1 }
 0x433   :  { %956 = vsyncpa [#allocation7], 1 }
 0x434   :  { %957 = vsyncpa [#allocation4], 1 }

</bundles_post_ra>
